<compile_context>
chip_gen: v6e
topology: v6e:2x2x1
jax: 0.10.0
libtpu: 0.0.40
codegen_flags: <defaults>
</compile_context>

<pallas_src>
import math

import jax
import jax.numpy as jnp
from jax.experimental import pallas as pl
from jax.experimental.pallas import tpu as pltpu


def _pos_encoding_table(max_seq_length: int, d_model: int) -> jnp.ndarray:
    """Deterministic sinusoidal positional-encoding buffer, shape (1, S, D), f32."""
    position = jnp.arange(0, max_seq_length, dtype=jnp.float32)[:, None]      # (S, 1)
    div_term = jnp.exp(
        jnp.arange(0, d_model, 2, dtype=jnp.float32) * -(math.log(10000.0) / d_model)
    )                                                                          # (D/2,)
    angles = position * div_term                                               # (S, D/2)
    pe = jnp.zeros((max_seq_length, d_model), dtype=jnp.float32)
    pe = pe.at[:, 0::2].set(jnp.sin(angles))
    pe = pe.at[:, 1::2].set(jnp.cos(angles))
    return pe[None, :, :]                                                      # (1, S, D)


def _pick_tile(dim: int, align: int, target: int) -> int:
    """Largest multiple of `align` that divides `dim` and is <= `target`.

    Falls back to the full dim (always legal for the (8,128) rule) when the
    dim is not aligned or no aligned divisor exists.
    """
    if dim % align != 0:
        return dim
    t = (min(target, dim) // align) * align
    while t > 0 and dim % t != 0:
        t -= align
    return t if t > 0 else dim


def _pe_add_kernel(x_ref, pe_ref, o_ref):
    # x_ref: (TB, TL)  pe_ref: (1, TL)  o_ref: (TB, TL)
    # pe sublane-broadcasts over the batch rows; pure VPU add, lane-dense store.
    o_ref[...] = x_ref[...] + pe_ref[...]


def positional_encoding_forward(x: jnp.ndarray, pe: jnp.ndarray, *, donate_x: bool = False) -> jnp.ndarray:
    """x: (B, S, D); pe: (1, max_S, D). Returns x + pe[:, :S] (same dtype as x)."""
    B, S, D = x.shape
    pe_sliced = pe[:, :S, :].astype(x.dtype)       # static slice + dtype match (glue)

    # Lane-dense 2-D view: last dim becomes S*D instead of D.
    L = S * D
    x2 = x.reshape(B, L)
    pe2 = pe_sliced.reshape(1, L)

    # Tile sizes: <= 256 x 2048 blocks -> <= 2 MiB/block (f32); with x/out/pe
    # double-buffered that's well under the 32 MiB scoped-VMEM default on
    # v5e/v6e and within v7x's 64 MiB physical VMEM.
    TB = _pick_tile(B, 8, 256)
    TL = _pick_tile(L, 128, 2048)

    # Batch innermost so the pe block index (0, l) is constant across
    # consecutive steps -> pe stays resident, no re-fetch per batch tile.
    grid = (L // TL, B // TB)

    out2 = pl.pallas_call(
        _pe_add_kernel,
        out_shape=jax.ShapeDtypeStruct((B, L), x.dtype),
        grid=grid,
        in_specs=[
            pl.BlockSpec((TB, TL), lambda l, b: (b, l)),   # x tile
            pl.BlockSpec((1, TL), lambda l, b: (0, l)),    # pe tile (batch-broadcast)
        ],
        out_specs=pl.BlockSpec((TB, TL), lambda l, b: (b, l)),
        compiler_params=pltpu.CompilerParams(
            dimension_semantics=("parallel", "parallel"),  # elementwise: both axes shardable
        ),
        input_output_aliases=({0: 0} if donate_x else {}),
    )(x2, pe2)

    return out2.reshape(B, S, D)


if __name__ == "__main__":
    key = jax.random.PRNGKey(0)

    # --- shapes implied by the PyTorch module: d_model=8, small seq, batch=2 ---
    d_model = 8
    max_seq_length = 8
    batch = 2

    x = jax.random.uniform(key, (batch, max_seq_length, d_model), dtype=jnp.float32)
    pe = _pos_encoding_table(max_seq_length, d_model)

    out = jax.block_until_ready(positional_encoding_forward(x, pe))
    ref = x + pe[:, :max_seq_length].astype(x.dtype)
    assert out.shape == (batch, max_seq_length, d_model)
    assert jnp.allclose(out, ref, atol=1e-6), "mismatch vs reference (small case)"

    # --- secondary check exercising the tiled / lane-dense / aliased paths ---
    k2 = jax.random.PRNGKey(0)
    B2, S2, D2 = 16, 512, 16                      # L = 8192 -> grid (4, 1)
    x2 = jax.random.normal(k2, (B2, S2, D2), dtype=jnp.float32)
    pe2 = _pos_encoding_table(S2, D2)

    out2 = jax.block_until_ready(positional_encoding_forward(x2, pe2))
    ref2 = x2 + pe2[:, :S2]
    assert jnp.allclose(out2, ref2, atol=1e-6), "mismatch vs reference (tiled case)"

    out3 = jax.block_until_ready(positional_encoding_forward(x2, pe2, donate_x=True))
    assert jnp.allclose(out3, ref2, atol=1e-6), "mismatch vs reference (aliased case)"

    print("KERNEL_OK")
</pallas_src>

<mosaic_0001>
module attributes {stable_mosaic.version = 11 : i64} {
  func.func @_pe_add_kernel(%arg0: i32, %arg1: i32, %arg2: memref<2x64xf32, #tpu.memory_space<vmem>>, %arg3: memref<1x64xf32, #tpu.memory_space<vmem>>, %arg4: memref<2x64xf32, #tpu.memory_space<vmem>>) attributes {dimension_semantics = [#tpu.dimension_semantics<parallel>, #tpu.dimension_semantics<parallel>], iteration_bounds = array<i64: 1, 1>, scalar_prefetch = 0 : i64, scratch_operands = 0 : i64, tpu.core_type = #tpu.core_type<tc>, window_params = [{transform_indices = @transform_0, window_bounds = array<i64: 2, 64>}, {transform_indices = @transform_1, window_bounds = array<i64: 1, 64>}, {transform_indices = @transform_2, window_bounds = array<i64: 2, 64>}]} {
    %c0 = arith.constant 0 : index
    %c0_0 = arith.constant 0 : index
    %0 = vector.load %arg2[%c0, %c0_0] : memref<2x64xf32, #tpu.memory_space<vmem>>, vector<2x64xf32>
    %c0_1 = arith.constant 0 : index
    %c0_2 = arith.constant 0 : index
    %1 = vector.load %arg3[%c0_1, %c0_2] : memref<1x64xf32, #tpu.memory_space<vmem>>, vector<1x64xf32>
    %2 = vector.broadcast %1 : vector<1x64xf32> to vector<2x64xf32>
    %3 = arith.addf %0, %2 : vector<2x64xf32>
    %c0_3 = arith.constant 0 : index
    %c0_4 = arith.constant 0 : index
    %4 = vector.load %arg4[%c0_3, %c0_4] : memref<2x64xf32, #tpu.memory_space<vmem>>, vector<2x64xf32>
    tpu.vector_store %arg4[%c0_3, %c0_4], %3 {strides = array<i32>} : memref<2x64xf32, #tpu.memory_space<vmem>>, vector<2x64xf32>,
    return
  }
  func.func @transform_0(%arg0: i32, %arg1: i32) -> (i32, i32) {
    %c0_i32 = arith.constant 0 : i32
    return %arg1, %arg0 : i32, i32
  }
  func.func @transform_1(%arg0: i32, %arg1: i32) -> (i32, i32) {
    %c0_i32 = arith.constant 0 : i32
    %c0_i32_0 = arith.constant 0 : i32
    return %c0_i32, %arg0 : i32, i32
  }
  func.func @transform_2(%arg0: i32, %arg1: i32) -> (i32, i32) {
    %c0_i32 = arith.constant 0 : i32
    return %arg1, %arg0 : i32, i32
  }
}

</mosaic_0001>

<bundles_post_ra>
// kernel: tpu_custom_call.1
= control target key start
LH: loop header
LB: loop body
LE: loop exit
PB: predicated region body
PF: predicated region fallthrough
CT: control target
= control target key end

     0   :  { %7 = vsyncpa [#allocation3], 0  ;;  %s123_s0 = inlined_call_operand.hbm [shape: f32[2,64], index: 0, kind: input, shape index: {}]   ;;  %s124_s1 = inlined_call_operand.vmem [shape: f32[1,64], index: 1, kind: input, shape index: {}]   ;;  %s125_s2 = inlined_call_operand.hbm [shape: f32[2,64], index: 2, kind: output, shape index: {}]  }
   0x1   :  { %8 = vsyncpa [#allocation4], 0  ;;  %s97_s9 = smov [#allocation2]  }
   0x2   :  { %s15_s10 = sshll.u32 %s97_s9, 4  ;;  %s16_s10 = int_to_ptr.vmem [resolvable:$true] %s15_s10 }
   0x3   :  { %s61_s11 = scalar_lea.vmem %s16_s10, 32  ;;  %p66_p1 = scmp.lt.s32.totalorder %s16_s10, %s16_s10 }
   0x4   :  { %p62_p0 = scmp.ne.s32.totalorder %s16_s10, %s61_s11  ;;  %p67_p2 = scmp.lt.s32.totalorder %s61_s11, %s61_s11 }
   0x6   :  { %p68_p3 = por %p67_p2, %p66_p1 }
   0x8   :  { %p69_p4 = pnand %p68_p3, %p62_p0 }
   0xa   :  { %72 = shalt.err (!%p69_p4)
}
   0xb   :  { %18 = dma.hbm_to_vmem [thread:$0]  %s123_s0, 32, %s16_s10, [#allocation3]  }
   0xc   :  { %93 = dma.done.wait [#allocation3], 32  }
   0xd   :  { %94 = vsyncadd [#allocation3], 4294967264  ;;  %s98_s14 = smov [#allocation5]   ;;  %v24_v0 = vld [vmem:[#allocation2] sm:$0x3]  ;;  %vm33_vm0 = vcmask 517120  }
   0xe   :  { %s41_s15 = sshll.u32 %s98_s14, 4  ;;  %v50_v1 = vld [vmem:[%s124_s1] ss:$0 sm:$0xff]  ;;  %s42_s15 = int_to_ptr.vmem [resolvable:$true] %s41_s15 }
   0xf   :  { %v32_v2 = vadd.f32 %v50_v1, %v24_v0  ;;  %s73_s18 = scalar_lea.vmem %s42_s15, 32  ;;  %p78_p6 = scmp.lt.s32.totalorder %s42_s15, %s42_s15 }
  0x10   :  { %p74_p5 = scmp.ne.s32.totalorder %s42_s15, %s73_s18  ;;  %p79_p7 = scmp.lt.s32.totalorder %s73_s18, %s73_s18 }
  0x11   :  { %34 = vst.msk [vmem:[#allocation5] sm:$0x3] %vm33_vm0, %v32_v2 }
  0x12   :  { %p80_p8 = por %p79_p7, %p78_p6 }
  0x14   :  { %p81_p9 = pnand %p80_p8, %p74_p5 }
  0x16   :  { %84 = shalt.err (!%p81_p9)
}
  0x17   :  { %44 = dma.vmem_to_hbm [thread:$0]  %s42_s15, 32, %s125_s2, [#allocation4]  }
  0x18   :  { %95 = dma.done.wait [#allocation4], 32  }
  0x19   :  { %96 = vsyncadd [#allocation4], 4294967264 }
  0x1a   :  { %48 = vsyncpa [#allocation3], 1 }
  0x1b   :  { %49 = vsyncpa [#allocation4], 1 }

</bundles_post_ra>
